<compile_context>
chip_gen: v6e
topology: v6e:2x2x1
jax: 0.10.0
libtpu: 0.0.40
codegen_flags: <defaults>
</compile_context>

<pallas_src>
import functools

import jax
import jax.numpy as jnp
from jax.experimental import pallas as pl
from jax.experimental.pallas import tpu as pltpu


def _tap_kernel(x_ref, o_ref, acc_ref, *, tt, t_total, ragged_t):
    """x_ref: (bb, tt, F) input tile; o_ref: (bb, F) output slab;
    acc_ref: (bb, F) f32 accumulator (persists across the T grid axis)."""
    t = pl.program_id(1)

    @pl.when(t == 0)
    def _():
        acc_ref[...] = jnp.zeros_like(acc_ref)

    x = x_ref[...].astype(jnp.float32)  # f32 accumulate (bf16-safe)
    if ragged_t:
        # Zero out the out-of-bounds T rows of the (padded) last T block.
        t_idx = jax.lax.broadcasted_iota(jnp.int32, x.shape, 1) + t * tt
        x = jnp.where(t_idx < t_total, x, 0.0)
    acc_ref[...] += jnp.sum(x, axis=1)

    @pl.when(t == pl.num_programs(1) - 1)
    def _():
        o_ref[...] = acc_ref[...].astype(o_ref.dtype)


def _vmem_capacity_bytes():
    """Physical VMEM of the current TPU generation; conservative fallback."""
    try:
        return int(pltpu.get_tpu_info().vmem_capacity_bytes)
    except Exception:
        return 64 * 1024 * 1024  # v7x per-TensorCore size; safe everywhere


def _pick_blocks(B, T_eff, F_eff, itemsize, tile_budget):
    """Choose (bb, tt): batch-rows per block and T-rows per block such that the
    input tile (bb, tt, F_eff) fits in ~tile_budget bytes (single buffer)."""
    sub = {4: 8, 2: 16, 1: 32}.get(itemsize, 8)  # sublane tile for this dtype
    row_bytes = T_eff * F_eff * itemsize

    if row_bytes <= tile_budget:
        # Whole sequence per example fits: block over batch only.
        tt = T_eff
        bb = min(B, max(1, tile_budget // row_bytes))
        # v7x has 2 TensorCores: keep >=2 steps on the parallel batch axis when
        # that does not break sublane alignment (no-op perf-wise on v5e/v6e).
        if bb >= B and B >= 2 * sub:
            bb = B // 2
    else:
        # One example's sequence exceeds the budget: tile the T reduction axis.
        bb = 1
        tt_raw = max(1, tile_budget // (F_eff * itemsize))
        tt = min(T_eff, max(sub, (tt_raw // sub) * sub))

    # Align the (bb, F_eff) output slab's sublane dim when it is a partial
    # batch block (full-batch blocks are fine as-is).
    if 1 < bb < B:
        align = sub if bb >= sub else 8
        bb = max(1, (bb // align) * align)
    return bb, tt


def temporal_attention_pooling(x, w=None, b=None, *, _tile_budget_bytes=None):
    """x: [B, T, F].  w ([F, 1]) and b ([1, 1]) are accepted for API parity
    with the PyTorch module but are mathematically dead in the forward value
    (softmax over a size-1 channel dim -> attn == 1.0 exactly), so they are
    never DMA'd.  Returns [B, 1, F]."""
    del w, b
    B, T, F = x.shape
    itemsize = x.dtype.itemsize

    # Lane-density fold: view (B, T, F) as (B, T//k, k*F) so the last dim fills
    # all 128 lanes (a free reshape of a contiguous array); residual fold below.
    k = 1
    if 0 < F < 128 and 128 % F == 0:
        kk = 128 // F
        if T % kk == 0:
            k = kk
    T_eff, F_eff = T // k, F * k
    x_eff = x.reshape(B, T_eff, F_eff) if k > 1 else x

    vmem_phys = _vmem_capacity_bytes()
    tile_budget = _tile_budget_bytes or max(1 << 20, vmem_phys // 8)
    vmem_limit = (vmem_phys * 5) // 8  # 80 MiB on v5e/v6e, 40 MiB on v7x

    bb, tt = _pick_blocks(B, T_eff, F_eff, itemsize, tile_budget)
    grid_b = pl.cdiv(B, bb)
    grid_t = pl.cdiv(T_eff, tt)
    ragged_t = (T_eff % tt) != 0

    kernel = functools.partial(_tap_kernel, tt=tt, t_total=T_eff,
                               ragged_t=ragged_t)

    out2d = pl.pallas_call(
        kernel,
        out_shape=jax.ShapeDtypeStruct((B, F_eff), x.dtype),
        grid_spec=pltpu.PrefetchScalarGridSpec(
            num_scalar_prefetch=0,
            grid=(grid_b, grid_t),                      # reduction axis last
            in_specs=[pl.BlockSpec((bb, tt, F_eff), lambda i, t: (i, t, 0))],
            out_specs=pl.BlockSpec((bb, F_eff), lambda i, t: (i, 0)),
            scratch_shapes=[pltpu.VMEM((bb, F_eff), jnp.float32)],
        ),
        compiler_params=pltpu.CompilerParams(
            dimension_semantics=("parallel", "arbitrary"),
            vmem_limit_bytes=int(vmem_limit),
        ),
    )(x_eff)

    if k > 1:
        out2d = out2d.reshape(B, k, F).sum(axis=1)  # tiny residual fold in XLA
    return out2d.reshape(B, 1, F)


def _reference(x, w, b):
    # Literal pure-JAX mirror of the PyTorch forward (Conv1d 1x1 + Softmax).
    logits = jnp.einsum("btf,fo->bto", x, w) + b.reshape(())   # [B, T, 1]
    attn = jax.nn.softmax(logits, axis=-1)                     # size-1 axis -> all ones
    return jnp.sum(attn * x, axis=1, keepdims=True)            # [B, 1, F]


if __name__ == "__main__":
    key = jax.random.PRNGKey(0)
    kx, kw, kb, kx2, kx3 = jax.random.split(key, 5)

    # Primary shapes from the module spec: [batch, history_len, feature_size].
    B, T, F = 2, 8, 32
    x = jax.random.normal(kx, (B, T, F), dtype=jnp.float32)
    bound = 3e-3  # mimics catalyst's outer_init small-uniform bound
    w = jax.random.uniform(kw, (F, 1), jnp.float32, -bound, bound)
    b = jax.random.uniform(kb, (1, 1), jnp.float32, -bound, bound)

    out = jax.block_until_ready(temporal_attention_pooling(x, w, b))
    ref = _reference(x, w, b)
    assert out.shape == (B, 1, F), out.shape
    assert jnp.allclose(out, ref, atol=1e-5, rtol=1e-5), "mismatch vs reference"

    # Exercise the T-tiled (ragged reduction) path with a forced tiny budget.
    x2 = jax.random.normal(kx2, (3, 13, 40), dtype=jnp.float32)
    out2 = jax.block_until_ready(
        temporal_attention_pooling(x2, _tile_budget_bytes=1024))
    assert jnp.allclose(out2, jnp.sum(x2, axis=1, keepdims=True),
                        atol=1e-4, rtol=1e-4), "mismatch (T-tiled path)"

    # Exercise the ragged-batch + lane-density-fold path.
    x3 = jax.random.normal(kx3, (12, 4, 32), dtype=jnp.float32)
    out3 = jax.block_until_ready(
        temporal_attention_pooling(x3, _tile_budget_bytes=4096))
    assert jnp.allclose(out3, jnp.sum(x3, axis=1, keepdims=True),
                        atol=1e-4, rtol=1e-4), "mismatch (ragged-batch path)"

    print("KERNEL_OK")
</pallas_src>

<mosaic_0001>
module attributes {stable_mosaic.version = 11 : i64} {
  func.func @_tap_kernel(%arg0: i32, %arg1: i32, %arg2: memref<2x2x128xf32, #tpu.memory_space<vmem>>, %arg3: memref<2x128xf32, #tpu.memory_space<vmem>>, %arg4: memref<2x128xf32, #tpu.memory_space<vmem>>) attributes {dimension_semantics = [#tpu.dimension_semantics<parallel>, #tpu.dimension_semantics<arbitrary>], iteration_bounds = array<i64: 1, 1>, scalar_prefetch = 0 : i64, scratch_operands = 1 : i64, tpu.core_type = #tpu.core_type<tc>, window_params = [{transform_indices = @transform_0, window_bounds = array<i64: 2, 2, 128>}, {transform_indices = @transform_1, window_bounds = array<i64: 2, 128>}]} {
    %c0_i32 = arith.constant 0 : i32
    %0 = arith.cmpi eq, %arg1, %c0_i32 : i32
    %1 = arith.extui %0 : i1 to i32
    %c0_i32_0 = arith.constant 0 : i32
    %2 = arith.cmpi ne, %1, %c0_i32_0 : i32
    scf.if %2 {
      %cst_9 = arith.constant 0.000000e+00 : f32
      %11 = vector.broadcast %cst_9 : f32 to vector<2x128xf32>
      %c0_10 = arith.constant 0 : index
      %c0_11 = arith.constant 0 : index
      %12 = vector.load %arg4[%c0_10, %c0_11] : memref<2x128xf32, #tpu.memory_space<vmem>>, vector<2x128xf32>
      tpu.vector_store %arg4[%c0_10, %c0_11], %11 {strides = array<i32>} : memref<2x128xf32, #tpu.memory_space<vmem>>, vector<2x128xf32>,
    } else {
    }
    %c0 = arith.constant 0 : index
    %c0_1 = arith.constant 0 : index
    %c0_2 = arith.constant 0 : index
    %3 = vector.load %arg2[%c0, %c0_1, %c0_2] : memref<2x2x128xf32, #tpu.memory_space<vmem>>, vector<2x2x128xf32>
    %c0_3 = arith.constant 0 : index
    %c0_4 = arith.constant 0 : index
    %4 = vector.load %arg4[%c0_3, %c0_4] : memref<2x128xf32, #tpu.memory_space<vmem>>, vector<2x128xf32>
    %cst = arith.constant dense<0.000000e+00> : vector<2x128xf32>
    %5 = vector.multi_reduction <add>, %3, %cst [1] : vector<2x2x128xf32> to vector<2x128xf32>
    %6 = arith.addf %4, %5 : vector<2x128xf32>
    %c0_5 = arith.constant 0 : index
    %c0_6 = arith.constant 0 : index
    %7 = vector.load %arg4[%c0_5, %c0_6] : memref<2x128xf32, #tpu.memory_space<vmem>>, vector<2x128xf32>
    tpu.vector_store %arg4[%c0_5, %c0_6], %6 {strides = array<i32>} : memref<2x128xf32, #tpu.memory_space<vmem>>, vector<2x128xf32>,
    %c0_i32_7 = arith.constant 0 : i32
    %8 = arith.cmpi eq, %arg1, %c0_i32_7 : i32
    %9 = arith.extui %8 : i1 to i32
    %c0_i32_8 = arith.constant 0 : i32
    %10 = arith.cmpi ne, %9, %c0_i32_8 : i32
    scf.if %10 {
      %c0_9 = arith.constant 0 : index
      %c0_10 = arith.constant 0 : index
      %11 = vector.load %arg4[%c0_9, %c0_10] : memref<2x128xf32, #tpu.memory_space<vmem>>, vector<2x128xf32>
      %c0_11 = arith.constant 0 : index
      %c0_12 = arith.constant 0 : index
      %12 = vector.load %arg3[%c0_11, %c0_12] : memref<2x128xf32, #tpu.memory_space<vmem>>, vector<2x128xf32>
      tpu.vector_store %arg3[%c0_11, %c0_12], %11 {strides = array<i32>} : memref<2x128xf32, #tpu.memory_space<vmem>>, vector<2x128xf32>,
    } else {
    }
    return
  }
  func.func @transform_0(%arg0: i32, %arg1: i32) -> (i32, i32, i32) {
    %c0_i32 = arith.constant 0 : i32
    %c0_i32_0 = arith.constant 0 : i32
    return %arg0, %arg1, %c0_i32 : i32, i32, i32
  }
  func.func @transform_1(%arg0: i32, %arg1: i32) -> (i32, i32) {
    %c0_i32 = arith.constant 0 : i32
    %c0_i32_0 = arith.constant 0 : i32
    return %arg0, %c0_i32 : i32, i32
  }
}

</mosaic_0001>

<bundles_post_ra>
// kernel: tpu_custom_call.1
= control target key start
LH: loop header
LB: loop body
LE: loop exit
PB: predicated region body
PF: predicated region fallthrough
CT: control target
= control target key end

     0   :  { %6 = vsyncpa [#allocation4], 0  ;;  %s143_s0 = inlined_call_operand.hbm [shape: f32[2,2,128], index: 0, kind: input, shape index: {}]   ;;  %s144_s1 = inlined_call_operand.hbm [shape: f32[2,128], index: 1, kind: output, shape index: {}]  }
   0x1   :  { %7 = vsyncpa [#allocation5], 0  ;;  %s122_s6 = smov [#allocation3]  }
   0x2   :  { %s13_s7 = sshll.u32 %s122_s6, 4  ;;  %s14_s7 = int_to_ptr.vmem [resolvable:$true] %s13_s7 }
   0x3   :  { %s86_s8 = scalar_lea.vmem %s14_s7, 64  ;;  %p91_p1 = scmp.lt.s32.totalorder %s14_s7, %s14_s7 }
   0x4   :  { %p87_p0 = scmp.ne.s32.totalorder %s14_s7, %s86_s8  ;;  %p92_p2 = scmp.lt.s32.totalorder %s86_s8, %s86_s8 }
   0x6   :  { %p93_p3 = por %p92_p2, %p91_p1 }
   0x8   :  { %p94_p4 = pnand %p93_p3, %p87_p0 }
   0xa   :  { %97 = shalt.err (!%p94_p4)
}
   0xb   :  { %s123_s9 = smov 32   ;;  %s124_s10 = smov 2  }
   0xc   :  { %19 = dma.hbm_to_vmem [thread:$0]  %s143_s0, 64, %s14_s7, [#allocation4], %s123_s9, %s123_s9, %s124_s10  }
   0xd   :  { %118 = dma.done.wait [#allocation4], 64  }
   0xe   :  { %119 = vsyncadd [#allocation4], 4294967232  ;;  %v125_v0 = vmov 0.0   ;;  %vm31_vm0 = vcmask 1041408   ;;  %v28_v1 = vld [vmem:[#allocation3] sm:$0x3] }
   0xf   :  { %27 = vst [vmem:[#allocation2] sm:$0x3] %v125_v0  ;;  %v29_v2 = vld [vmem:[#allocation3 + $0x2] sm:$0x3]  ;;  %v32_v3 = vsel %vm31_vm0, %v28_v1, 0.0  ;;  %vm48_vm1 = vcmask 1041409  }
  0x10   :  { %v39_v4 = vsel %vm31_vm0, %v29_v2, 0.0  ;;  %v33_v5 = vrot.slane %v32_v3, 4  ;;  %s126_s0 = smov [#allocation6]  }
  0x11   :  { %v40_v6 = vrot.slane %v39_v4, 4  ;;  %s64_s13 = sshll.u32 %s126_s0, 4  ;;  %s65_s13 = int_to_ptr.vmem [resolvable:$true] %s64_s13 }
  0x12   :  { %v34_v7 = vadd.f32 %v33_v5, %v32_v3  ;;  %s98_s14 = scalar_lea.vmem %s65_s13, 32  ;;  %p103_p6 = scmp.lt.s32.totalorder %s65_s13, %s65_s13 }
  0x13   :  { %v41_v8 = vadd.f32 %v40_v6, %v39_v4  ;;  %p99_p5 = scmp.ne.s32.totalorder %s65_s13, %s98_s14  ;;  %p104_p7 = scmp.lt.s32.totalorder %s98_s14, %s98_s14 }
  0x14   :  { %v35_v9 = vrot.slane %v34_v7, 2 }
  0x15   :  { %v42_v10 = vrot.slane %v41_v8, 2  ;;  %p105_p8 = por %p104_p7, %p103_p6 }
  0x16   :  { %v36_v11 = vadd.f32 %v35_v9, %v34_v7  ;;  %v30_v15 = vld [vmem:[#allocation2] sm:$0x3] }
  0x17   :  { %v43_v12 = vadd.f32 %v42_v10, %v41_v8  ;;  %p106_p9 = pnand %p105_p8, %p99_p5 }
  0x18   :  { %v37_v13 = vrot.slane %v36_v11, 1 }
  0x19   :  { %v44_v14 = vrot.slane %v43_v12, 1 }
  0x1a   :  { %v38_v16 = vadd.f32 %v37_v13, %v36_v11 }
  0x1b   :  { %v45_v17 = vadd.f32 %v44_v14, %v43_v12 }
  0x1d   :  { %v49_v18 = vsel %vm48_vm1, %v45_v17, %v38_v16 }
  0x1e   :  { %v51_v19 = vadd.f32 %v49_v18, %v30_v15 }
  0x20   :  { %52 = vst [vmem:[#allocation2] sm:$0x3] %v51_v19 }
  0x27   :  { %v56_v20 = vld [vmem:[#allocation2] sm:$0x3] }
  0x28   :  { %57 = vst [vmem:[#allocation6] sm:$0x3] %v56_v20 }
  0x29   :  { %109 = shalt.err (!%p106_p9)
}
  0x2a   :  { %67 = dma.vmem_to_hbm [thread:$0]  %s65_s13, 32, %s144_s1, [#allocation5]  }
  0x2b   :  { %120 = dma.done.wait [#allocation5], 32  }
  0x2c   :  { %121 = vsyncadd [#allocation5], 4294967264 }
  0x2d   :  { %71 = vsyncpa [#allocation4], 1 }
  0x2e   :  { %72 = vsyncpa [#allocation5], 1 }

</bundles_post_ra>
